<compile_context>
chip_gen: v6e
topology: v6e:2x2x1
jax: 0.10.0
libtpu: 0.0.40
codegen_flags: <defaults>
</compile_context>

<pallas_src>
import functools

import jax
import jax.numpy as jnp
from jax import lax
from jax.experimental import pallas as pl
from jax.experimental.pallas import tpu as pltpu


def _add_pos_and_store(gbuf, pos_ref, o_ref):
    """Vectorized epilogue: out = gathered_embeddings + positional_encoding."""
    if gbuf.dtype == pos_ref.dtype == o_ref.dtype:
        # All-native add (bf16 on v6e/v7x, f32 otherwise): no up/down casts.
        o_ref[0] = gbuf[...] + pos_ref[...]
    else:
        o_ref[0] = (gbuf[...].astype(jnp.float32)
                    + pos_ref[...].astype(jnp.float32)).astype(o_ref.dtype)
    # TODO(synk): training-mode dropout (pltpu.prng_* Bernoulli mask + 1/(1-p)
    # scale) not implemented; eval-mode dropout is the identity.


def _embed_vmem_table_kernel(ids_ref, tok_ref, pos_ref, o_ref, gbuf, *,
                             seq_len, tile_s):
    # ids_ref: [B*S]       int32, SMEM (scalar prefetch)
    # tok_ref: [V, D]      whole embedding table, VMEM (fetched once: constant block index)
    # pos_ref: [tile_s, D] positional tile (reused across the inner batch axis)
    # o_ref:   [1, tile_s, D]
    # gbuf:    [tile_s, D] VMEM gather buffer
    st = pl.program_id(0)
    b = pl.program_id(1)
    base = b * seq_len + st * tile_s

    def gather_row(i, carry):
        tok = ids_ref[base + i]
        gbuf[pl.ds(i, 1), :] = tok_ref[pl.ds(tok, 1), :]
        return carry

    lax.fori_loop(0, tile_s, gather_row, 0, unroll=8)
    _add_pos_and_store(gbuf, pos_ref, o_ref)


def _embed_hbm_gather_kernel(ids_ref, tok_hbm, pos_ref, o_ref, gbuf, sem, *,
                             seq_len, tile_s, window):
    # ids_ref: [B*S]       int32, SMEM (scalar prefetch)
    # tok_hbm: [V, D]      raw HBM ref (pl.ANY) -- token embedding table
    # pos_ref: [tile_s, D] positional tile
    # o_ref:   [1, tile_s, D]
    # gbuf:    [tile_s, D] VMEM gather landing buffer
    # sem:     (1,)        DMA semaphore shared by all row gathers of this tile
    st = pl.program_id(0)
    b = pl.program_id(1)
    base = b * seq_len + st * tile_s

    def start_row(i):
        tok = ids_ref[base + i]
        pltpu.make_async_copy(tok_hbm.at[tok], gbuf.at[i], sem.at[0]).start()

    def wait_one_row():
        # Every row copy moves an identical byte count, so one fixed-size wait
        # on the shared semaphore retires exactly one outstanding copy.  No
        # SMEM id re-read here (avoids the .wait() sst->sld forwarding stall).
        pltpu.make_async_copy(tok_hbm.at[0], gbuf.at[0], sem.at[0]).wait()

    in_flight = min(window, tile_s)

    # Prologue: fill the window.
    lax.fori_loop(0, in_flight, lambda i, c: (start_row(i), c)[1], 0, unroll=True)

    # Steady state: retire one copy, issue the next (<= `window` in flight, so
    # descriptor issue never saturates and code size stays bounded).
    if tile_s > in_flight:
        def steady(i, carry):
            wait_one_row()
            start_row(i)
            return carry
        lax.fori_loop(in_flight, tile_s, steady, 0, unroll=8)

    # Drain the copies still in flight; afterwards every gathered row is resident.
    lax.fori_loop(0, in_flight, lambda i, c: (wait_one_row(), c)[1], 0, unroll=True)

    _add_pos_and_store(gbuf, pos_ref, o_ref)
    # TODO(synk): cross-grid-step prefetch (double-buffered gbuf + (2,) sems,
    # issuing tile i+1's gathers before tile i's epilogue) for extra overlap.


def input_embedding(token_ids, token_table, pos_table, *, tile_s=None,
                    out_dtype=None, table_in_vmem=None, gather_window=8):
    """
    Args:
        token_ids:   [B, S] int32 token indices.
        token_table: [V, D] nn.Embedding(vocab_size, d_model).weight (f32 or bf16).
        pos_table:   [max_len, D] learned positional-embedding weight.
    Returns:
        [B, S, D] embeddings with positional encoding added (eval-mode dropout).
    """
    B, S = token_ids.shape
    V, D = token_table.shape
    max_len, d2 = pos_table.shape
    assert d2 == D, "pos_table d_model mismatch"
    assert S <= max_len, "seq_len exceeds max_len of the positional table"
    assert D % 128 == 0, "d_model should be a multiple of 128 for lane-dense stores"

    if out_dtype is None:
        out_dtype = token_table.dtype      # bf16 tables -> bf16 out (halves writeback)

    itemsize = jnp.dtype(token_table.dtype).itemsize
    pos_bytes = jnp.dtype(pos_table.dtype).itemsize
    out_bytes = jnp.dtype(out_dtype).itemsize
    table_bytes = V * D * itemsize
    row_bytes = D * itemsize

    # Dispatch: keep the whole table VMEM-resident when it is small, and also
    # when per-row gather payloads are too small (< 2 KiB) for the per-row HBM
    # DMA path to approach the bandwidth roofline (descriptor-setup bound).
    if table_in_vmem is None:
        small_table = table_bytes <= 8 * 1024 * 1024
        tiny_rows = (row_bytes < 2048) and (table_bytes <= 16 * 1024 * 1024)
        table_in_vmem = small_table or tiny_rows

    if tile_s is None:
        tile_s = min(256, S)
        # Keep the per-step working set modest so it also fits v7x's 64 MiB VMEM.
        while tile_s > 8 and tile_s * D * (itemsize + 2 * pos_bytes + 2 * out_bytes) > 16 * 1024 * 1024:
            tile_s //= 2
    assert S % tile_s == 0, "seq_len must be divisible by tile_s (pad upstream)"

    # 1-D ids avoid 2-D SMEM padding blow-up at production B*S.
    ids_flat = token_ids.reshape(B * S).astype(jnp.int32)
    pos_slice = pos_table[:S]              # positions 0..S-1 (static slice in JAX)

    # Seq-tile OUTER, batch INNER: consecutive steps reuse the same pos block.
    grid = (S // tile_s, B)
    pos_spec = pl.BlockSpec((tile_s, D), lambda st, b, ids: (st, 0))
    out_spec = pl.BlockSpec((1, tile_s, D), lambda st, b, ids: (b, st, 0))

    if table_in_vmem:
        kernel = functools.partial(_embed_vmem_table_kernel,
                                   seq_len=S, tile_s=tile_s)
        tok_spec = pl.BlockSpec((V, D), lambda st, b, ids: (0, 0))  # whole table, DMA'd once
        scratch = [pltpu.VMEM((tile_s, D), token_table.dtype)]
    else:
        kernel = functools.partial(_embed_hbm_gather_kernel,
                                   seq_len=S, tile_s=tile_s, window=gather_window)
        tok_spec = pl.BlockSpec(memory_space=pl.ANY)                # table stays in HBM
        scratch = [pltpu.VMEM((tile_s, D), token_table.dtype),
                   pltpu.SemaphoreType.DMA((1,))]

    # Raise the scoped VMEM limit only when the estimated footprint needs it.
    est_vmem = tile_s * D * (itemsize + 2 * pos_bytes + 2 * out_bytes)
    if table_in_vmem:
        est_vmem += 2 * table_bytes
    vmem_limit = None
    if est_vmem > 24 * 1024 * 1024:
        vmem_limit = min(int(est_vmem * 1.5) + (1 << 20), 64 * 1024 * 1024)

    return pl.pallas_call(
        kernel,
        out_shape=jax.ShapeDtypeStruct((B, S, D), out_dtype),
        grid_spec=pltpu.PrefetchScalarGridSpec(
            num_scalar_prefetch=1,                  # flattened token ids -> SMEM
            grid=grid,
            in_specs=[tok_spec, pos_spec],
            out_specs=out_spec,
            scratch_shapes=scratch,
        ),
        compiler_params=pltpu.CompilerParams(
            dimension_semantics=("parallel", "parallel"),
            vmem_limit_bytes=vmem_limit,
        ),
    )(ids_flat, token_table, pos_slice)


if __name__ == "__main__":
    # Small, deterministic configuration consistent with the module's forward.
    B, S = 2, 16           # batch_size, seq_len
    V, D = 512, 128        # vocab_size, d_model (D multiple of 128 -> unmasked stores)
    MAX_LEN = 64           # max_len for the learned positional encoding
    TILE_S = 8             # token rows per grid step (auto-sized at real seq lens)

    key = jax.random.PRNGKey(0)
    k_tok, k_emb, k_pos = jax.random.split(key, 3)

    token_ids = jax.random.randint(k_tok, (B, S), 0, V, dtype=jnp.int32)
    token_table = jax.random.normal(k_emb, (V, D), dtype=jnp.float32)      # token_embedding.weight
    pos_table = jax.random.normal(k_pos, (MAX_LEN, D), dtype=jnp.float32)  # learned pos-enc weight

    # Pure-JAX reference.
    ref = jnp.take(token_table, token_ids, axis=0) + pos_table[None, :S, :]

    # Path A: VMEM-resident table fast path (auto-selected for this small table).
    out_vmem = input_embedding(token_ids, token_table, pos_table, tile_s=TILE_S)
    out_vmem = jax.block_until_ready(out_vmem)
    assert out_vmem.shape == (B, S, D)
    assert jnp.allclose(out_vmem, ref, atol=1e-5, rtol=1e-5)

    # Path B: HBM sliding-window DMA-gather path (forced, for coverage).
    out_hbm = input_embedding(token_ids, token_table, pos_table, tile_s=TILE_S,
                              table_in_vmem=False)
    out_hbm = jax.block_until_ready(out_hbm)
    assert jnp.allclose(out_hbm, ref, atol=1e-5, rtol=1e-5)

    print("KERNEL_OK")
</pallas_src>

<mosaic_0001>
module attributes {stable_mosaic.version = 11 : i64} {
  func.func @_embed_vmem_table_kernel(%arg0: i32, %arg1: i32, %arg2: memref<32xi32, #tpu.memory_space<smem>>, %arg3: memref<512x128xf32, #tpu.memory_space<vmem>>, %arg4: memref<8x128xf32, #tpu.memory_space<vmem>>, %arg5: memref<1x8x128xf32, #tpu.memory_space<vmem>>, %arg6: memref<8x128xf32, #tpu.memory_space<vmem>>) attributes {dimension_semantics = [#tpu.dimension_semantics<parallel>, #tpu.dimension_semantics<parallel>], iteration_bounds = array<i64: 2, 2>, scalar_prefetch = 1 : i64, scratch_operands = 1 : i64, tpu.core_type = #tpu.core_type<tc>, window_params = [{pipeline_mode = #tpu.pipeline_mode<synchronous>, transform_indices = @transform_0, window_bounds = array<i64: 512, 128>}, {transform_indices = @transform_1, window_bounds = array<i64: 8, 128>}, {transform_indices = @transform_2, window_bounds = array<i64: 1, 8, 128>}]} {
    %c16_i32 = arith.constant 16 : i32
    %0 = arith.muli %arg1, %c16_i32 : i32
    %c8_i32 = arith.constant 8 : i32
    %1 = arith.muli %arg0, %c8_i32 : i32
    %2 = arith.addi %0, %1 : i32
    %c0_i32 = arith.constant 0 : i32
    %3 = arith.addi %2, %c0_i32 : i32
    %4 = arith.index_cast %3 : i32 to index
    %5 = memref.load %arg2[%4] : memref<32xi32, #tpu.memory_space<smem>>
    %6 = arith.index_cast %5 : i32 to index
    %c0 = arith.constant 0 : index
    %7 = vector.load %arg3[%6, %c0] : memref<512x128xf32, #tpu.memory_space<vmem>>, vector<1x128xf32>
    %8 = arith.index_cast %c0_i32 : i32 to index
    %c0_0 = arith.constant 0 : index
    %9 = vector.load %arg6[%8, %c0_0] : memref<8x128xf32, #tpu.memory_space<vmem>>, vector<1x128xf32>
    tpu.vector_store %arg6[%8, %c0_0], %7 {strides = array<i32>} : memref<8x128xf32, #tpu.memory_space<vmem>>, vector<1x128xf32>,
    %c1_i32 = arith.constant 1 : i32
    %10 = arith.addi %2, %c1_i32 : i32
    %11 = arith.index_cast %10 : i32 to index
    %12 = memref.load %arg2[%11] : memref<32xi32, #tpu.memory_space<smem>>
    %13 = arith.index_cast %12 : i32 to index
    %c0_1 = arith.constant 0 : index
    %14 = vector.load %arg3[%13, %c0_1] : memref<512x128xf32, #tpu.memory_space<vmem>>, vector<1x128xf32>
    %15 = arith.index_cast %c1_i32 : i32 to index
    %c0_2 = arith.constant 0 : index
    %16 = vector.load %arg6[%15, %c0_2] : memref<8x128xf32, #tpu.memory_space<vmem>>, vector<1x128xf32>
    tpu.vector_store %arg6[%15, %c0_2], %14 {strides = array<i32>} : memref<8x128xf32, #tpu.memory_space<vmem>>, vector<1x128xf32>,
    %c2_i32 = arith.constant 2 : i32
    %17 = arith.addi %2, %c2_i32 : i32
    %18 = arith.index_cast %17 : i32 to index
    %19 = memref.load %arg2[%18] : memref<32xi32, #tpu.memory_space<smem>>
    %20 = arith.index_cast %19 : i32 to index
    %c0_3 = arith.constant 0 : index
    %21 = vector.load %arg3[%20, %c0_3] : memref<512x128xf32, #tpu.memory_space<vmem>>, vector<1x128xf32>
    %22 = arith.index_cast %c2_i32 : i32 to index
    %c0_4 = arith.constant 0 : index
    %23 = vector.load %arg6[%22, %c0_4] : memref<8x128xf32, #tpu.memory_space<vmem>>, vector<1x128xf32>
    tpu.vector_store %arg6[%22, %c0_4], %21 {strides = array<i32>} : memref<8x128xf32, #tpu.memory_space<vmem>>, vector<1x128xf32>,
    %c3_i32 = arith.constant 3 : i32
    %24 = arith.addi %2, %c3_i32 : i32
    %25 = arith.index_cast %24 : i32 to index
    %26 = memref.load %arg2[%25] : memref<32xi32, #tpu.memory_space<smem>>
    %27 = arith.index_cast %26 : i32 to index
    %c0_5 = arith.constant 0 : index
    %28 = vector.load %arg3[%27, %c0_5] : memref<512x128xf32, #tpu.memory_space<vmem>>, vector<1x128xf32>
    %29 = arith.index_cast %c3_i32 : i32 to index
    %c0_6 = arith.constant 0 : index
    %30 = vector.load %arg6[%29, %c0_6] : memref<8x128xf32, #tpu.memory_space<vmem>>, vector<1x128xf32>
    tpu.vector_store %arg6[%29, %c0_6], %28 {strides = array<i32>} : memref<8x128xf32, #tpu.memory_space<vmem>>, vector<1x128xf32>,
    %c4_i32 = arith.constant 4 : i32
    %31 = arith.addi %2, %c4_i32 : i32
    %32 = arith.index_cast %31 : i32 to index
    %33 = memref.load %arg2[%32] : memref<32xi32, #tpu.memory_space<smem>>
    %34 = arith.index_cast %33 : i32 to index
    %c0_7 = arith.constant 0 : index
    %35 = vector.load %arg3[%34, %c0_7] : memref<512x128xf32, #tpu.memory_space<vmem>>, vector<1x128xf32>
    %36 = arith.index_cast %c4_i32 : i32 to index
    %c0_8 = arith.constant 0 : index
    %37 = vector.load %arg6[%36, %c0_8] : memref<8x128xf32, #tpu.memory_space<vmem>>, vector<1x128xf32>
    tpu.vector_store %arg6[%36, %c0_8], %35 {strides = array<i32>} : memref<8x128xf32, #tpu.memory_space<vmem>>, vector<1x128xf32>,
    %c5_i32 = arith.constant 5 : i32
    %38 = arith.addi %2, %c5_i32 : i32
    %39 = arith.index_cast %38 : i32 to index
    %40 = memref.load %arg2[%39] : memref<32xi32, #tpu.memory_space<smem>>
    %41 = arith.index_cast %40 : i32 to index
    %c0_9 = arith.constant 0 : index
    %42 = vector.load %arg3[%41, %c0_9] : memref<512x128xf32, #tpu.memory_space<vmem>>, vector<1x128xf32>
    %43 = arith.index_cast %c5_i32 : i32 to index
    %c0_10 = arith.constant 0 : index
    %44 = vector.load %arg6[%43, %c0_10] : memref<8x128xf32, #tpu.memory_space<vmem>>, vector<1x128xf32>
    tpu.vector_store %arg6[%43, %c0_10], %42 {strides = array<i32>} : memref<8x128xf32, #tpu.memory_space<vmem>>, vector<1x128xf32>,
    %c6_i32 = arith.constant 6 : i32
    %45 = arith.addi %2, %c6_i32 : i32
    %46 = arith.index_cast %45 : i32 to index
    %47 = memref.load %arg2[%46] : memref<32xi32, #tpu.memory_space<smem>>
    %48 = arith.index_cast %47 : i32 to index
    %c0_11 = arith.constant 0 : index
    %49 = vector.load %arg3[%48, %c0_11] : memref<512x128xf32, #tpu.memory_space<vmem>>, vector<1x128xf32>
    %50 = arith.index_cast %c6_i32 : i32 to index
    %c0_12 = arith.constant 0 : index
    %51 = vector.load %arg6[%50, %c0_12] : memref<8x128xf32, #tpu.memory_space<vmem>>, vector<1x128xf32>
    tpu.vector_store %arg6[%50, %c0_12], %49 {strides = array<i32>} : memref<8x128xf32, #tpu.memory_space<vmem>>, vector<1x128xf32>,
    %c7_i32 = arith.constant 7 : i32
    %52 = arith.addi %2, %c7_i32 : i32
    %53 = arith.index_cast %52 : i32 to index
    %54 = memref.load %arg2[%53] : memref<32xi32, #tpu.memory_space<smem>>
    %55 = arith.index_cast %54 : i32 to index
    %c0_13 = arith.constant 0 : index
    %56 = vector.load %arg3[%55, %c0_13] : memref<512x128xf32, #tpu.memory_space<vmem>>, vector<1x128xf32>
    %57 = arith.index_cast %c7_i32 : i32 to index
    %c0_14 = arith.constant 0 : index
    %58 = vector.load %arg6[%57, %c0_14] : memref<8x128xf32, #tpu.memory_space<vmem>>, vector<1x128xf32>
    tpu.vector_store %arg6[%57, %c0_14], %56 {strides = array<i32>} : memref<8x128xf32, #tpu.memory_space<vmem>>, vector<1x128xf32>,
    %c8_i32_15 = arith.constant 8 : i32
    %c0_16 = arith.constant 0 : index
    %c0_17 = arith.constant 0 : index
    %59 = vector.load %arg6[%c0_16, %c0_17] : memref<8x128xf32, #tpu.memory_space<vmem>>, vector<8x128xf32>
    %c0_18 = arith.constant 0 : index
    %c0_19 = arith.constant 0 : index
    %60 = vector.load %arg4[%c0_18, %c0_19] : memref<8x128xf32, #tpu.memory_space<vmem>>, vector<8x128xf32>
    %61 = arith.addf %59, %60 : vector<8x128xf32>
    %c0_20 = arith.constant 0 : index
    %c0_21 = arith.constant 0 : index
    %c0_22 = arith.constant 0 : index
    %62 = vector.load %arg5[%c0_20, %c0_21, %c0_22] : memref<1x8x128xf32, #tpu.memory_space<vmem>>, vector<1x8x128xf32>
    %63 = vector.shape_cast %62 : vector<1x8x128xf32> to vector<8x128xf32>
    %64 = vector.shape_cast %61 : vector<8x128xf32> to vector<1x8x128xf32>
    tpu.vector_store %arg5[%c0_20, %c0_21, %c0_22], %64 {strides = array<i32>} : memref<1x8x128xf32, #tpu.memory_space<vmem>>, vector<1x8x128xf32>,
    return
  }
  func.func @transform_0(%arg0: i32, %arg1: i32, %arg2: memref<32xi32, #tpu.memory_space<smem>>) -> (i32, i32) {
    %c0_i32 = arith.constant 0 : i32
    %c0_i32_0 = arith.constant 0 : i32
    %c0_i32_1 = arith.constant 0 : i32
    return %c0_i32, %c0_i32_0 : i32, i32
  }
  func.func @transform_1(%arg0: i32, %arg1: i32, %arg2: memref<32xi32, #tpu.memory_space<smem>>) -> (i32, i32) {
    %c0_i32 = arith.constant 0 : i32
    %c0_i32_0 = arith.constant 0 : i32
    return %arg0, %c0_i32 : i32, i32
  }
  func.func @transform_2(%arg0: i32, %arg1: i32, %arg2: memref<32xi32, #tpu.memory_space<smem>>) -> (i32, i32, i32) {
    %c0_i32 = arith.constant 0 : i32
    %c0_i32_0 = arith.constant 0 : i32
    return %arg1, %arg0, %c0_i32 : i32, i32, i32
  }
}

</mosaic_0001>

<bundles_post_ra>
// kernel: tpu_custom_call.1
= control target key start
LH: loop header
LB: loop body
LE: loop exit
PB: predicated region body
PF: predicated region fallthrough
CT: control target
= control target key end

     0   :  { %s682_s12 = smov [#allocation4]   ;;  %s919_s0 = inlined_call_operand.hbm [shape: s32[32], index: 0, kind: input, shape index: {}]   ;;  %s920_s1 = inlined_call_operand.hbm [shape: f32[512,128], index: 1, kind: input, shape index: {}]   ;;  %s921_s2 = inlined_call_operand.hbm [shape: f32[16,128], index: 2, kind: input, shape index: {}]   ;;  %s922_s3 = inlined_call_operand.hbm [shape: f32[2,16,128], index: 3, kind: output, shape index: {}]  }
   0x1   :  { %930 = sst [smem:[#allocation20_spill]] %s920_s1 }
   0x2   :  { %931 = sst [smem:[#allocation21_spill]] %s921_s2 }
   0x3   :  { %932 = sst [smem:[#allocation22_spill]] %s922_s3 }
   0x4   :  { %9 = dma.hbm_to_smem %s919_s0, 16, %s682_s12, [#allocation3] }
   0x5   :  { %624 = dma.done.wait [#allocation3], 16 }
   0x6   :  { %625 = vsyncadd [#allocation3], 4294967280 }
   0x7   :  { %11 = sfence }
   0x8   :  { %12 = vsyncpa [#allocation6], 0 }
   0x9   :  { %13 = vsyncpa [#allocation9], 0 }
   0xa   :  { %15 = vsyncpa [#allocation9 + $0x1], 0 }
   0xb   :  { %16 = vsyncpa [#allocation7], 0 }
   0xc   :  { %18 = vsyncpa [#allocation7 + $0x1], 0  ;;  %s711_s15 = smov 0   ;;  %s713_s16 = smov 0  }
   0xd   :  { %s715_s17 = smov 0   ;;  %s717_s18 = smov 0  }
   0xe   :  { %s719_s19 = smov 0   ;;  %s721_s20 = smov 0  }
   0xf   :  { %s723_s0 = smov 0   ;;  %s725_s21 = smov 0  }
  0x10   :  { %s727_s22 = smov 0   ;;  %s729_s23 = smov 0  }
  0x11   :  { %s731_s24 = smov 0  }
  0x12 LB: > { %933 = sst [smem:[#allocation15_spill]] %s640_s15  ;;  %s358_s25 = sadd.s32 4294967295, %s680_s24   ;;  %s680_s24 = sphi %s731_s24, %s24_s24   ;;  %s676_s23 = sphi %s729_s23, %s963_s23   ;;  %s672_s22 = sphi %s727_s22, %s954_s22   ;;  %s668_s21 = sphi %s725_s21, %s962_s21   ;;  %s664_s0 = sphi %s723_s0, %s953_s0   ;;  %s660_s20 = sphi %s721_s20, %s961_s20   ;;  %s656_s19 = sphi %s719_s19, %s960_s19   ;;  %s652_s18 = sphi %s717_s18, %s959_s18   ;;  %s648_s17 = sphi %s715_s17, %s958_s17   ;;  %s644_s16 = sphi %s713_s16, %s957_s16   ;;  %s640_s15 = sphi %s711_s15, %s956_s15  }
  0x13   : > { %934 = sst [smem:[#allocation16_spill]] %s672_s22  ;;  %s359_s26 = sadd.s32 4294967294, %s680_s24  }
  0x14   : > { %p77_p0 = scmp.ne.s32.totalorder %s656_s19, %s652_s18  ;;  %p767_p1 = scmp.eq.s32.totalorder %s358_s25, 0 }
  0x15   : > { %p102_p2 = scmp.ne.s32.totalorder %s648_s17, %s644_s16  ;;  %p103_p3 = scmp.eq.s32.totalorder %s358_s25, 3 }
  0x16   : > { %p775_p4 = por %p767_p1, %p77_p0  ;;  %p108_p5 = scmp.ne.s32.totalorder %s644_s16, %s640_s15 }
  0x17   : > { %p781_p6 = por %p103_p3, %p102_p2  ;;  %p109_p7 = scmp.eq.s32.totalorder %s359_s26, 3 }
  0x18   : > { %p360_p8 = scmp.ge.s32.totalorder %s680_s24, 1  ;;  %p116_p9 = scmp.lt.s32.totalorder %s680_s24, 5 }
  0x19   : > { %s937_s29 = scalar_select %p781_p6, 1, 0 }
  0x1a   : > { %p787_p10 = por %p109_p7, %p108_p5  ;;  %p791_p11 = pnand %p360_p8, %p116_p9 }
  0x1b   : > { %s683_s5 = smov [#allocation5]  }
  0x1c   : > { %s938_s30 = scalar_select %p787_p10, 1, 0 }
  0x1d   : > { %s128_s6 = sshll.u32 %s683_s5, 4  ;;  %p384_p12 = pneg %p791_p11  ;;  %s129_s6 = int_to_ptr.vmem [resolvable:$true] %s128_s6 }
  0x1e   : > { %939 = sst [smem:[#allocation17_spill]] %s938_s30  ;;  %s511_s7 = scalar_lea.vmem %s129_s6, 8192 }
  0x1f   : > { %p385_p13 = pnand %p384_p12, %p767_p1  ;;  %p512_p2 = scmp.ne.s32.totalorder %s129_s6, %s511_s7 }
  0x20   : > { %p519_p7 = scmp.lt.s32.totalorder %s129_s6, %s129_s6  ;;  %p520_p6 = scmp.lt.s32.totalorder %s511_s7, %s511_s7 }
  0x21   : > { %p502_p0 = pneg %p385_p13 }
  0x22   : > { %p521_p10 = por %p520_p6, %p519_p7 }
  0x23   : > { %p514_p3 = pnand %p512_p2, %p502_p0 }
  0x25   : > { %p515_p5 = pneg %p514_p3 }
  0x27   : > { %p522_p8 = pnand %p521_p10, %p515_p5 }
  0x29   : > { %525 = shalt.err (!%p522_p8)
}
  0x2a   : > { %s684_s8 = smov 128   ;;  %s685_s9 = smov 8  }
  0x2b   : > { %s941_s1 = sld [smem:[#allocation20_spill]]  ;;  %s33_s12 = sadd.s32 1, %s672_s22 }
  0x2c   : > { %s36_s13 = sadd.s32 1, %s676_s23  ;;  %p34_p6 = scmp.ge.s32.totalorder %s33_s12, 2 }
  0x2d   : > { %s64_s14 = sadd.s32 1, %s660_s20  ;;  %p71_p9 = scmp.ne.s32.totalorder %s660_s20, %s656_s19 }
  0x2e   : > { %p72_p10 = scmp.eq.s32.totalorder %s680_s24, 0  ;;  %s965_s12 = smov (%p34_p6, %s33_s12), 0 }
  0x2f   : > { %942 = sst [smem:[#allocation18_spill]] %s965_s12  ;;  %s967_s13 = smov (!%p34_p6, %s36_s13), %s676_s23 }
  0x30   : > { %p811_p12 = por %p72_p10, %p71_p9  ;;  %s87_s25 = ssub.s32 %s672_s22, %s965_s12 }
  0x31   : > { %387 = dma.hbm_to_vmem [thread:$0]  (!%p385_p13), %s941_s1, 8192, %s129_s6, [#allocation6], %s684_s8, %s684_s8, %s685_s9  }
  0x32   : > { %p38_p13 = scmp.ge.s32.totalorder %s967_s13, 2  ;;  %s92_s26 = sadd.s32 1, %s648_s17 }
  0x33   : > { %p397_p0 = scmp.lt.s32.totalorder %s680_s24, 4  ;;  %s142_s5 = sand.u32 1, %s660_s20  }
  0x34   : > { %s969_s13 = smov (%p38_p13, %s967_s13), 0  ;;  %s363_s6 = sshll.u32 %s142_s5, 3 }
  0x35   : > { %944 = sst [smem:[#allocation19_spill]] %s969_s13  ;;  %s61_s7 = ssub.s32 %s676_s23, %s969_s13 }
  0x36   : > { %p62_p2 = scmp.eq.s32.totalorder %s61_s7, 0  ;;  %s89_s8 = sor.u32 %s87_s25, %s61_s7 }
  0x37   : > { %p90_p3 = scmp.eq.s32.totalorder %s89_s8, 0  ;;  %s364_s9 = sshll.u32 %s676_s23, 7 }
  0x38   : > { %s826_s10 = scalar_select %p62_p2, %s660_s20, %s64_s14  }
  0x39   : > { %s829_s11 = scalar_select %p90_p3, %s648_s17, %s92_s26  }
  0x3a   : > { %s945_s2 = sld [smem:[#allocation21_spill]]  ;;  %s146_s30 = scalar_lea.vmem [#allocation8], %s363_s6 }
  0x3b   : > { %s153_s15 = sshll.u32 %s146_s30, 4  ;;  %p838_p5 = pnand %p397_p0, %p811_p12  ;;  %s154_s15 = int_to_ptr.vmem [resolvable:$true] %s153_s15 }
  0x3c   : > { %s143_s25 = scalar_lea.sflag [#allocation9], %s142_s5  ;;  %s539_s14 = scalar_lea.vmem %s154_s15, 128 }
  0x3d   : > { %p528_p7 = pneg %p838_p5  ;;  %p540_p8 = scmp.ne.s32.totalorder %s154_s15, %s539_s14 }
  0x3e   : > { %s686_s26 = smov [#allocation8]  }
  0x3f   : > { %p542_p6 = pnand %p540_p8, %p528_p7  ;;  %s544_s1 = sshll.u32 %s686_s26, 4  ;;  %s545_s1 = int_to_ptr.vmem [resolvable:$false] %s544_s1 }
  0x40   : > { %s151_s22 = scalar_lea.hbm %s945_s2, %s364_s9  ;;  %s546_s12 = scalar_lea.vmem %s545_s1, 256 }
  0x41   : > { %p543_p9 = pneg %p542_p6  ;;  %p547_p10 = scmp.lt.s32.totalorder %s154_s15, %s545_s1 }
  0x42   : > { %p548_p13 = scmp.lt.s32.totalorder %s546_s12, %s539_s14 }
  0x44   : > { %p549_p2 = por %p548_p13, %p547_p10 }
  0x46   : > { %p550_p3 = pnand %p549_p2, %p543_p9 }
  0x48   : > { %553 = shalt.err (!%p550_p3)
}
  0x49   : > { %391 = dma.hbm_to_vmem [thread:$0]  (!%p838_p5), %s151_s22, 128, %s154_s15, %s143_s25  }
  0x4a   : > { %162 = sbr.rel (%p791_p11) target bundleno = 124 (0x7c), region = 28 }
  0x4f   : > { %627 = dma.done.wait (%p767_p1), [#allocation6], 8192  }
  0x50   : > { %629 = vsyncadd (%p767_p1), [#allocation6], 4294959104  ;;  %s168_s30 = sand.u32 1, %s656_s19  }
  0x51   : > { %s853_s18 = sshll.u32 %s168_s30, 3  ;;  %s169_s5 = scalar_lea.sflag [#allocation9], %s168_s30 }
  0x52   : > { %631 = dma.done.wait (%p775_p4), %s169_s5, 128  }
  0x53   : > { %633 = vsyncadd (%p775_p4), %s169_s5, 4294967168  ;;  %s369_s3 = sshll.u32 %s664_s0, 4  ;;  %s370_s15 = sshll.u32 %s668_s21, 3 }
  0x54   : > { %s195_s22 = sadd.s32 %s370_s15, %s369_s3  ;;  %p949_p4 = scmp.ne.s32.totalorder %s937_s29, 0 }
  0x55   : > { %s196_s27 = sld [smem:[#allocation4 + %s195_s22]]  ;;  %s200_s4 = sadd.s32 1, %s195_s22 }
  0x56   : > { %s201_s7 = sld [smem:[#allocation4 + %s200_s4]]  ;;  %s205_s8 = sadd.s32 2, %s195_s22 }
  0x57   : > { %s206_s9 = sld [smem:[#allocation4 + %s205_s8]]  ;;  %s210_s25 = sadd.s32 3, %s195_s22 }
  0x58   : > { %s211_s14 = sld [smem:[#allocation4 + %s210_s25]]  ;;  %s215_s26 = sadd.s32 4, %s195_s22 }
  0x59   : > { %s216_s1 = sld [smem:[#allocation4 + %s215_s26]]  ;;  %s220_s12 = sadd.s32 5, %s195_s22 }
  0x5a   : > { %s221_s30 = sld [smem:[#allocation4 + %s220_s12]]  ;;  %s225_s6 = sadd.s32 6, %s195_s22 }
  0x5b   : > { %s226_s2 = sld [smem:[#allocation4 + %s225_s6]]  ;;  %s197_s28 = scalar_lea.vmem [#allocation5], %s196_s27 }
  0x5c   : > { %v198_v0 = vld [vmem:[%s197_s28] sm:$0x1]  ;;  %s230_s5 = sadd.s32 7, %s195_s22  ;;  %s202_s13 = scalar_lea.vmem [#allocation5], %s201_s7 }
  0x5d   : > { %199 = vst [vmem:[#allocation2] sm:$0x1] %v198_v0  ;;  %v203_v1 = vld [vmem:[%s202_s13] sm:$0x1]  ;;  %s231_s3 = sld [smem:[#allocation4 + %s230_s5]]  ;;  %s207_s15 = scalar_lea.vmem [#allocation5], %s206_s9 }
  0x5e   : > { %204 = vst [vmem:[#allocation2 + $0x1] sm:$0x1] %v203_v1  ;;  %v208_v2 = vld [vmem:[%s207_s15] sm:$0x1]  ;;  %s212_s4 = scalar_lea.vmem [#allocation5], %s211_s14  ;;  %s190_s22 = sand.u32 1, %s644_s16  }
  0x5f   : > { %209 = vst [vmem:[#allocation2 + $0x2] sm:$0x1] %v208_v2  ;;  %v213_v3 = vld [vmem:[%s212_s4] sm:$0x1]  ;;  %s217_s8 = scalar_lea.vmem [#allocation5], %s216_s1  ;;  %s368_s7 = sshll.u32 %s190_s22, 3 }
  0x60   : > { %214 = vst [vmem:[#allocation2 + $0x3] sm:$0x1] %v213_v3  ;;  %v218_v4 = vld [vmem:[%s217_s8] sm:$0x1]  ;;  %s222_s6 = scalar_lea.vmem [#allocation5], %s221_s30  ;;  %s372_s9 = sshll.u32 %s664_s0, 1 }
  0x61   : > { %219 = vst [vmem:[#allocation2 + $0x4] sm:$0x1] %v218_v4  ;;  %v223_v5 = vld [vmem:[%s222_s6] sm:$0x1]  ;;  %s227_s27 = scalar_lea.vmem [#allocation5], %s226_s2  ;;  %s251_s25 = sadd.s32 %s668_s21, %s372_s9 }
  0x62   : > { %224 = vst [vmem:[#allocation2 + $0x5] sm:$0x1] %v223_v5  ;;  %v228_v6 = vld [vmem:[%s227_s27] sm:$0x1]  ;;  %s947_s14 = scalar_lea.vmem [#allocation8], %s853_s18  ;;  %s192_s26 = scalar_lea.vmem [#allocation10], %s368_s7 }
  0x63   : > { %229 = vst [vmem:[#allocation2 + $0x6] sm:$0x1] %v228_v6  ;;  %s232_s13 = scalar_lea.vmem [#allocation5], %s231_s3  ;;  %v236_v8 = vld [vmem:[%s947_s14] sm:$0xff]  ;;  %s255_s1 = sshll.u32 %s192_s26, 4  ;;  %s256_s1 = int_to_ptr.vmem [resolvable:$true] %s255_s1 }
  0x64   : > { %v233_v7 = vld [vmem:[%s232_s13] sm:$0x1]  ;;  %s373_s12 = sshll.u32 %s251_s25, 7  ;;  %s948_s2 = sld [smem:[#allocation22_spill]] }
  0x65   : > { %234 = vst [vmem:[#allocation2 + $0x7] sm:$0x1] %v233_v7  ;;  %s240_s3 = scalar_lea.sflag [#allocation7], %s190_s22  ;;  %s554_s15 = scalar_lea.vmem %s256_s1, 128 }
  0x66   : > { %p555_p1 = scmp.ne.s32.totalorder %s256_s1, %s554_s15  ;;  %s687_s0 = smov [#allocation10]  }
  0x67   : > { %s558_s21 = sshll.u32 %s687_s0, 4  ;;  %s559_s21 = int_to_ptr.vmem [resolvable:$false] %s558_s21 }
  0x68   : > { %p556_p11 = pnand %p555_p1, %p949_p4  ;;  %s560_s18 = scalar_lea.vmem %s559_s21, 256 }
  0x69   : > { %p561_p0 = scmp.lt.s32.totalorder %s256_s1, %s559_s21  ;;  %p562_p5 = scmp.lt.s32.totalorder %s560_s18, %s554_s15 }
  0x6a   : > { %s253_s5 = scalar_lea.hbm %s948_s2, %s373_s12  ;;  %p557_p12 = pneg %p556_p11 }
  0x6b   : > { %p563_p7 = por %p562_p5, %p561_p0 }
  0x6c   : > { %v235_v9 = vld [vmem:[#allocation2] sm:$0xff] }
  0x6d   : > { %v237_v10 = vadd.f32 %v236_v8, %v235_v9  ;;  %p564_p8 = pnand %p563_p7, %p557_p12 }
  0x6f   : > { %238 = vst [vmem:[%s192_s26] sm:$0xff] %v237_v10 }
  0x70   : > { %567 = shalt.err (!%p564_p8)
}
  0x71   : > { %s568_s4 = scalar_lea.hbm %s253_s5, 128  ;;  %s572_s22 = scalar_lea.hbm %s948_s2, 512 }
  0x72   : > { %p569_p6 = scmp.ne.s32.totalorder %s253_s5, %s568_s4  ;;  %p573_p13 = scmp.lt.s32.totalorder %s253_s5, %s948_s2 }
  0x73   : > { %p574_p2 = scmp.lt.s32.totalorder %s572_s22, %s568_s4 }
  0x74   : > { %p570_p9 = pnand %p569_p6, %p949_p4 }
  0x75   : > { %p575_p3 = por %p574_p2, %p573_p13 }
  0x76   : > { %p571_p10 = pneg %p570_p9 }
  0x78   : > { %p576_p1 = pnand %p575_p3, %p571_p10 }
  0x7a   : > { %579 = shalt.err (!%p576_p1)
}
  0x7b   : > { %382 = dma.vmem_to_hbm [thread:$0]  (%p949_p4), %s256_s1, 128, %s253_s5, %s240_s3  }
  0x7c PF: > { %s950_s7 = sld [smem:[#allocation15_spill]]  ;;  %p399_p11 = scmp.ge.s32.totalorder %s680_s24, 2 }
  0x7d   : > { %s951_s9 = sld [smem:[#allocation17_spill]] }
  0x82   : > { %s267_s25 = sand.u32 1, %s950_s7  }
  0x83   : > { %p952_p12 = scmp.ne.s32.totalorder %s951_s9, 0  ;;  %s268_s14 = scalar_lea.sflag [#allocation7], %s267_s25 }
  0x85   : > { %p393_p0 = pnand %p399_p11, %p952_p12 }
  0x87   : > { %p394_p5 = pneg %p393_p0 }
  0x89   : > { %635 = dma.done.wait (%p394_p5), %s268_s14, 128  }
  0x8a   : > { %637 = vsyncadd (%p394_p5), %s268_s14, 4294967168  ;;  %s24_s24 = sadd.s32 1, %s680_s24   ;;  %s953_s0 = sld [smem:[#allocation16_spill]] }
  0x8b   : > { %p21_p7 = scmp.ge.s32.totalorder %s24_s24, 6   ;;  %s954_s22 = sld [smem:[#allocation18_spill]] }
  0x8c   : > { %s955_s29 = sld [smem:[#allocation19_spill]]  ;;  %s956_s15 = smov %s644_s16 }
  0x8d   : > { %s957_s16 = smov %s648_s17  ;;  %s958_s17 = smov %s829_s11 }
  0x8e   : > { %s959_s18 = smov %s656_s19  ;;  %s960_s19 = smov %s660_s20 }
  0x8f   : > { %s961_s20 = smov %s826_s10  ;;  %s962_s21 = smov %s676_s23 }
  0x90   :  { %23 = sbr.rel (!%p21_p7) target bundleno = 18 (0x12), region = 86 }
  0x92   : > { %s963_s23 = smov %s955_s29 }
  0x95   :  { %273 = vsyncpa [#allocation6], 1 }
  0x96   :  { %275 = vsyncpa [#allocation6 + $0x1], 1 }
  0x97   :  { %276 = vsyncpa [#allocation9], 1 }
  0x98   :  { %278 = vsyncpa [#allocation9 + $0x1], 1 }
  0x99   :  { %279 = vsyncpa [#allocation7], 1 }
  0x9a   :  { %281 = vsyncpa [#allocation7 + $0x1], 1 }

</bundles_post_ra>
